<compile_context>
chip_gen: v7x
topology: tpu7x:2x2x1
jax: 0.10.0
libtpu: 0.0.40
codegen_flags: <defaults>
</compile_context>

<pallas_src>
import math

import numpy as np
import jax
import jax.numpy as jnp
from jax import lax
from jax.experimental import pallas as pl
from jax.experimental.pallas import tpu as pltpu


# ---------------------------------------------------------------------------
# SnakeBeta as a Pallas TPU kernel
# ---------------------------------------------------------------------------

def _snake_beta_kernel(x_ref, alpha_ref, inv_beta_ref, o_ref):
    """x_ref/o_ref: (1, C, TILE_T); alpha_ref/inv_beta_ref: (C, 1) float32."""
    x = x_ref[...].astype(jnp.float32)
    alpha = alpha_ref[...][None, :, :]        # (1, C, 1), broadcast over T
    inv_beta = inv_beta_ref[...][None, :, :]  # (1, C, 1)
    s = jnp.sin(x * alpha)
    o_ref[...] = (x + inv_beta * (s * s)).astype(o_ref.dtype)


def _pick_tile_t(T: int, C: int, itemsize: int,
                 tile_budget_bytes: int = 2 * 1024 * 1024) -> int:
    """Largest lane-dense (multiple-of-128) tile of T that divides T and keeps
    one (C, TILE_T) buffer under ~tile_budget_bytes, so double-buffered input
    plus double-buffered output (~4 buffers) stay inside the default scoped
    VMEM limits on v5e/v6e/v7x. Falls back to the full T (always a legal
    block) when T is small or not 128-aligned."""
    if T % 128 != 0:
        return T
    max_tile = max(128, (tile_budget_bytes // max(1, C * itemsize)) // 128 * 128)
    tile = min(T, max_tile)
    while T % tile != 0:
        tile -= 128
    return tile


def snake_beta(x: jax.Array, log_alpha: jax.Array, log_beta: jax.Array,
               *, tile_t=None, vmem_limit_bytes=None) -> jax.Array:
    """SnakeBeta activation. x: (B, C, T); log_alpha, log_beta: (C,)."""
    B, C, T = x.shape

    # Hoist the parameter math out of the kernel: done once, in float32
    # (exp and the +1e-9 epsilon would lose precision / underflow in bf16).
    alpha = jnp.exp(log_alpha.astype(jnp.float32)).reshape(C, 1)
    inv_beta = (1.0 / (jnp.exp(log_beta.astype(jnp.float32)) + 1e-9)).reshape(C, 1)

    if tile_t is None:
        tile_t = _pick_tile_t(T, C, jnp.dtype(x.dtype).itemsize)
    if T % tile_t != 0:
        raise ValueError(f"tile_t={tile_t} must divide T={T}")
    nt = T // tile_t

    return pl.pallas_call(
        _snake_beta_kernel,
        out_shape=jax.ShapeDtypeStruct((B, C, T), x.dtype),
        grid_spec=pltpu.PrefetchScalarGridSpec(
            num_scalar_prefetch=0,
            grid=(B, nt),
            in_specs=[
                pl.BlockSpec((1, C, tile_t), lambda b, t: (b, 0, t)),
                pl.BlockSpec((C, 1), lambda b, t: (0, 0)),
                pl.BlockSpec((C, 1), lambda b, t: (0, 0)),
            ],
            out_specs=pl.BlockSpec((1, C, tile_t), lambda b, t: (b, 0, t)),
        ),
        compiler_params=pltpu.CompilerParams(
            # Pure elementwise map: every grid step owns a distinct output
            # block, so both axes may be sharded across TensorCores (v7x).
            dimension_semantics=("parallel", "parallel"),
            vmem_limit_bytes=vmem_limit_bytes,
        ),
    )(x, alpha, inv_beta)


def snake_beta_ref(x, log_alpha, log_beta):
    """Pure-JAX reference of the PyTorch snake_beta (f32 compute)."""
    alpha = jnp.exp(log_alpha.astype(jnp.float32))[None, :, None]
    beta = jnp.exp(log_beta.astype(jnp.float32))[None, :, None]
    xf = x.astype(jnp.float32)
    out = xf + 1.0 / (beta + 1e-9) * jnp.sin(xf * alpha) ** 2
    return out.astype(x.dtype)


# ---------------------------------------------------------------------------
# Fixed kaiser-sinc resampling + dilated Conv1d (XLA convolutions)
# ---------------------------------------------------------------------------

def kaiser_sinc_filter1d(cutoff: float, half_width: float, kernel_size: int) -> np.ndarray:
    """Exact port of the PyTorch reference; returns a (kernel_size,) float32 filter."""
    even = kernel_size % 2 == 0
    half_size = kernel_size // 2
    delta_f = 4 * half_width
    A = 2.285 * (half_size - 1) * math.pi * delta_f + 7.95
    if A > 50.0:
        beta = 0.1102 * (A - 8.7)
    elif A >= 21.0:
        beta = 0.5842 * (A - 21) ** 0.4 + 0.07886 * (A - 21.0)
    else:
        beta = 0.0
    window = np.kaiser(kernel_size, beta)
    if even:
        time = np.arange(-half_size, half_size) + 0.5
    else:
        time = np.arange(kernel_size) - half_size
    if cutoff == 0:
        return np.zeros(kernel_size, dtype=np.float32)
    filt = 2 * cutoff * window * np.sinc(2 * cutoff * time)
    filt = filt / filt.sum()
    return filt.astype(np.float32)


def _depthwise_filter(filt: jax.Array, C: int, dtype) -> jax.Array:
    K = filt.shape[-1]
    return jnp.broadcast_to(filt.reshape(1, 1, K), (C, 1, K)).astype(dtype)


def upsample1d(x: jax.Array, filt: jax.Array, *, ratio: int = 2,
               kernel_size: int = 12) -> jax.Array:
    """UpSample1d.forward: replicate-pad, depthwise transposed conv (stride=ratio),
    scale by ratio, crop. The kaiser-sinc filter is symmetric, so the transposed
    conv equals a correlation over the zero-dilated input with full padding."""
    _, C, _ = x.shape
    K = kernel_size
    stride = ratio
    pad = K // ratio - 1
    pad_left = pad * stride + (K - stride) // 2
    pad_right = pad * stride + (K - stride + 1) // 2
    xp = jnp.pad(x, ((0, 0), (0, 0), (pad, pad)), mode="edge")
    w = _depthwise_filter(filt, C, x.dtype)
    y = lax.conv_general_dilated(
        xp, w,
        window_strides=(1,),
        padding=((K - 1, K - 1),),
        lhs_dilation=(stride,),
        dimension_numbers=("NCH", "OIH", "NCH"),
        feature_group_count=C,
    )
    y = ratio * y
    return y[..., pad_left:-pad_right]


def downsample1d(x: jax.Array, filt: jax.Array, *, ratio: int = 2,
                 kernel_size: int = 12) -> jax.Array:
    """DownSample1d.forward: replicate-pad, depthwise strided conv."""
    _, C, _ = x.shape
    K = kernel_size
    even = K % 2 == 0
    pad_left = K // 2 - int(even)
    pad_right = K // 2
    xp = jnp.pad(x, ((0, 0), (0, 0), (pad_left, pad_right)), mode="edge")
    w = _depthwise_filter(filt, C, x.dtype)
    return lax.conv_general_dilated(
        xp, w,
        window_strides=(ratio,),
        padding=((0, 0),),
        dimension_numbers=("NCH", "OIH", "NCH"),
        feature_group_count=C,
    )


def conv1d_same(x: jax.Array, w: jax.Array, b: jax.Array, *, dilation: int) -> jax.Array:
    """nn.Conv1d(C, C, K, stride=1, dilation=d, padding=(K*d - d)//2)."""
    K = w.shape[-1]
    pad = (K * dilation - dilation) // 2
    y = lax.conv_general_dilated(
        x, w.astype(x.dtype),
        window_strides=(1,),
        padding=((pad, pad),),
        rhs_dilation=(dilation,),
        dimension_numbers=("NCH", "OIH", "NCH"),
    )
    return y + b.astype(x.dtype)[None, :, None]


# ---------------------------------------------------------------------------
# AMPBlock1 forward
# ---------------------------------------------------------------------------

def amp_block1_forward(x: jax.Array, params, *, kernel_size: int = 3,
                       dilation=(1, 3, 5), snake_fn=None) -> jax.Array:
    """AMPBlock1.forward. `params` is a list (one entry per dilation) of dicts
    with the two SnakeBeta parameter pairs and two Conv1d weight/bias pairs."""
    if snake_fn is None:
        snake_fn = snake_beta
    filt = jnp.asarray(kaiser_sinc_filter1d(cutoff=0.5 / 2, half_width=0.6 / 2,
                                            kernel_size=12))
    for d, p in zip(dilation, params):
        xt = upsample1d(x, filt, ratio=2, kernel_size=12)
        xt = snake_fn(xt, p["log_alpha1"], p["log_beta1"])   # Pallas kernel
        xt = downsample1d(xt, filt, ratio=2, kernel_size=12)
        xt = conv1d_same(xt, p["conv1_w"], p["conv1_b"], dilation=d)
        xt = upsample1d(xt, filt, ratio=2, kernel_size=12)
        xt = snake_fn(xt, p["log_alpha2"], p["log_beta2"])   # Pallas kernel
        xt = downsample1d(xt, filt, ratio=2, kernel_size=12)
        xt = conv1d_same(xt, p["conv2_w"], p["conv2_b"], dilation=1)
        x = xt + x
    return x


if __name__ == "__main__":
    key = jax.random.PRNGKey(0)
    B, C, T = 2, 4, 16
    kernel_size = 3
    dilation = (1, 3, 5)

    key, kx = jax.random.split(key)
    x = jax.random.normal(kx, (B, C, T), dtype=jnp.float32)

    # AMPBlock1 parameters. (The PyTorch module zero-inits log_alpha/log_beta;
    # small non-zero values are used so the exp / broadcast paths are exercised.)
    params = []
    for _ in dilation:
        key, *ks = jax.random.split(key, 9)
        params.append(dict(
            log_alpha1=0.1 * jax.random.normal(ks[0], (C,), jnp.float32),
            log_beta1=0.1 * jax.random.normal(ks[1], (C,), jnp.float32),
            conv1_w=0.1 * jax.random.normal(ks[2], (C, C, kernel_size), jnp.float32),
            conv1_b=0.01 * jax.random.normal(ks[3], (C,), jnp.float32),
            log_alpha2=0.1 * jax.random.normal(ks[4], (C,), jnp.float32),
            log_beta2=0.1 * jax.random.normal(ks[5], (C,), jnp.float32),
            conv2_w=0.1 * jax.random.normal(ks[6], (C, C, kernel_size), jnp.float32),
            conv2_b=0.01 * jax.random.normal(ks[7], (C,), jnp.float32),
        ))

    # 1) Pallas SnakeBeta vs pure-JAX reference (f32 I/O).
    la, lb = params[0]["log_alpha1"], params[0]["log_beta1"]
    out = snake_beta(x, la, lb)
    jax.block_until_ready(out)
    ref = snake_beta_ref(x, la, lb)
    assert out.shape == (B, C, T)
    assert jnp.allclose(out, ref, atol=1e-5, rtol=1e-5)

    # 2) bf16 I/O path (f32 internal compute) on a lane-dense 128-wide tile.
    key, kb = jax.random.split(key)
    xb = jax.random.normal(kb, (2, 16, 128), dtype=jnp.float32).astype(jnp.bfloat16)
    zero16 = jnp.zeros((16,), jnp.float32)
    out_b = snake_beta(xb, zero16, zero16)
    jax.block_until_ready(out_b)
    ref_b = snake_beta_ref(xb, zero16, zero16)
    assert jnp.allclose(out_b.astype(jnp.float32), ref_b.astype(jnp.float32),
                        atol=1e-2, rtol=1e-2)

    # 3) Full AMPBlock1 forward with the Pallas SnakeBeta inside, checked
    #    against the same forward using the pure-JAX activation.
    y = amp_block1_forward(x, params, kernel_size=kernel_size, dilation=dilation)
    jax.block_until_ready(y)
    y_ref = amp_block1_forward(x, params, kernel_size=kernel_size, dilation=dilation,
                               snake_fn=snake_beta_ref)
    assert y.shape == (B, C, T)
    assert bool(jnp.all(jnp.isfinite(y)))
    assert jnp.allclose(y, y_ref, atol=1e-4, rtol=1e-4)

    print("KERNEL_OK")
</pallas_src>

<mosaic_0001>
module attributes {stable_mosaic.version = 11 : i64} {
  func.func @_snake_beta_kernel(%arg0: i32, %arg1: i32, %arg2: memref<1x4x16xf32, #tpu.memory_space<vmem>>, %arg3: memref<4x1xf32, #tpu.memory_space<vmem>>, %arg4: memref<4x1xf32, #tpu.memory_space<vmem>>, %arg5: memref<1x4x16xf32, #tpu.memory_space<vmem>>) attributes {dimension_semantics = [#tpu.dimension_semantics<parallel>, #tpu.dimension_semantics<parallel>], iteration_bounds = array<i64: 2, 1>, scalar_prefetch = 0 : i64, scratch_operands = 0 : i64, tpu.core_type = #tpu.core_type<tc>, window_params = [{transform_indices = @transform_0, window_bounds = array<i64: 1, 4, 16>}, {pipeline_mode = #tpu.pipeline_mode<synchronous>, transform_indices = @transform_1, window_bounds = array<i64: 4, 1>}, {pipeline_mode = #tpu.pipeline_mode<synchronous>, transform_indices = @transform_2, window_bounds = array<i64: 4, 1>}, {transform_indices = @transform_3, window_bounds = array<i64: 1, 4, 16>}]} {
    %c0 = arith.constant 0 : index
    %c0_0 = arith.constant 0 : index
    %c0_1 = arith.constant 0 : index
    %0 = vector.load %arg2[%c0, %c0_0, %c0_1] : memref<1x4x16xf32, #tpu.memory_space<vmem>>, vector<1x4x16xf32>
    %c0_2 = arith.constant 0 : index
    %c0_3 = arith.constant 0 : index
    %1 = vector.load %arg3[%c0_2, %c0_3] : memref<4x1xf32, #tpu.memory_space<vmem>>, vector<4x1xf32>
    %2 = vector.shape_cast %1 : vector<4x1xf32> to vector<1x4x1xf32>
    %c0_4 = arith.constant 0 : index
    %c0_5 = arith.constant 0 : index
    %3 = vector.load %arg4[%c0_4, %c0_5] : memref<4x1xf32, #tpu.memory_space<vmem>>, vector<4x1xf32>
    %4 = vector.shape_cast %3 : vector<4x1xf32> to vector<1x4x1xf32>
    %5 = vector.broadcast %2 : vector<1x4x1xf32> to vector<1x4x16xf32>
    %6 = arith.mulf %0, %5 : vector<1x4x16xf32>
    %7 = math.sin %6 : vector<1x4x16xf32>
    %8 = arith.mulf %7, %7 : vector<1x4x16xf32>
    %9 = vector.broadcast %4 : vector<1x4x1xf32> to vector<1x4x16xf32>
    %10 = arith.mulf %9, %8 : vector<1x4x16xf32>
    %11 = arith.addf %0, %10 : vector<1x4x16xf32>
    %c0_6 = arith.constant 0 : index
    %c0_7 = arith.constant 0 : index
    %c0_8 = arith.constant 0 : index
    %12 = vector.load %arg5[%c0_6, %c0_7, %c0_8] : memref<1x4x16xf32, #tpu.memory_space<vmem>>, vector<1x4x16xf32>
    tpu.vector_store %arg5[%c0_6, %c0_7, %c0_8], %11 {strides = array<i32>} : memref<1x4x16xf32, #tpu.memory_space<vmem>>, vector<1x4x16xf32>,
    return
  }
  func.func @transform_0(%arg0: i32, %arg1: i32) -> (i32, i32, i32) {
    %c0_i32 = arith.constant 0 : i32
    %c0_i32_0 = arith.constant 0 : i32
    return %arg0, %c0_i32, %arg1 : i32, i32, i32
  }
  func.func @transform_1(%arg0: i32, %arg1: i32) -> (i32, i32) {
    %c0_i32 = arith.constant 0 : i32
    %c0_i32_0 = arith.constant 0 : i32
    %c0_i32_1 = arith.constant 0 : i32
    return %c0_i32, %c0_i32_0 : i32, i32
  }
  func.func @transform_2(%arg0: i32, %arg1: i32) -> (i32, i32) {
    %c0_i32 = arith.constant 0 : i32
    %c0_i32_0 = arith.constant 0 : i32
    %c0_i32_1 = arith.constant 0 : i32
    return %c0_i32, %c0_i32_0 : i32, i32
  }
  func.func @transform_3(%arg0: i32, %arg1: i32) -> (i32, i32, i32) {
    %c0_i32 = arith.constant 0 : i32
    %c0_i32_0 = arith.constant 0 : i32
    return %arg0, %c0_i32, %arg1 : i32, i32, i32
  }
}

</mosaic_0001>

<bundles_post_ra>
// kernel: tpu_custom_call.1
= control target key start
LH: loop header
LB: loop body
LE: loop exit
PB: predicated region body
PF: predicated region fallthrough
CT: control target
= control target key end

     0   :  { %8 = vsyncpa [#allocation3], 0  ;;  %s737_s0 = inlined_call_operand.vmem [shape: f32[2,4,16], index: 0, kind: input, shape index: {}]   ;;  %s738_s1 = inlined_call_operand.vmem [shape: f32[4,1], index: 1, kind: input, shape index: {}]   ;;  %s739_s2 = inlined_call_operand.vmem [shape: f32[4,1], index: 2, kind: input, shape index: {}]   ;;  %s740_s3 = inlined_call_operand.hbm [shape: f32[2,4,16], index: 3, kind: output, shape index: {}]  }
   0x1   :  { %10 = vsyncpa [#allocation3 + $0x1], 0  ;;  %s594_s12 = smov 0   ;;  %s596_s13 = smov 0  }
   0x2   :  { %s598_s14 = smov 0   ;;  %s600_s15 = smov 0  }
   0x3   :  { %s602_s16 = smov 0   ;;  %s604_s17 = smov 0  }
   0x4 LB: > { %s400_s18 = sadd.s32 4294967295, %s564_s17   ;;  %s401_s19 = sadd.s32 4294967294, %s564_s17   ;;  %s564_s17 = sphi %s604_s17, %s16_s17   ;;  %s560_s16 = sphi %s602_s16, %s747_s16   ;;  %s556_s15 = sphi %s600_s15, %s746_s15   ;;  %s552_s14 = sphi %s598_s14, %s745_s14   ;;  %s548_s13 = sphi %s596_s13, %s744_s13   ;;  %s544_s12 = sphi %s594_s12, %s743_s12  }
   0x5   : > { %s28_s20 = sadd.s32 1, %s560_s16  ;;  %s107_s21 = sadd.s32 1, %s552_s14 }
   0x6   : > { %p30_p0 = scmp.ge.s32.totalorder %s28_s20, 2  ;;  %p117_p1 = scmp.ne.s32.totalorder %s552_s14, %s548_s13 }
   0x7   : > { %p118_p2 = scmp.eq.s32.totalorder %s400_s18, 1  ;;  %p123_p3 = scmp.ne.s32.totalorder %s548_s13, %s544_s12 }
   0x8   : > { %s749_s20 = smov (%p30_p0, %s28_s20), 0  ;;  %p124_p5 = scmp.eq.s32.totalorder %s401_s19, 1 }
   0x9   : > { %p634_p4 = por %p118_p2, %p117_p1  ;;  %s102_s23 = ssub.s32 %s560_s16, %s749_s20 }
   0xa   : > { %p404_p6 = scmp.ge.s32.totalorder %s564_s17, 1  ;;  %p105_p7 = scmp.eq.s32.totalorder %s102_s23, 0 }
   0xb   : > { %p641_p8 = por %p124_p5, %p123_p3  ;;  %p158_p9 = scmp.lt.s32.totalorder %s564_s17, 3 }
   0xc   : > { %s647_s25 = scalar_select %p105_p7, %s552_s14, %s107_s21  }
   0xd   : > { %p159_p10 = pnand %p404_p6, %p158_p9 }
   0xe   : > { %v192_v0 = vld [vmem:[%s738_s1] sm:$0xf] (!%p159_p10)  ;;  %v566_v1 = vmov (!%p159_p10), 0   ;;  %p184_p11 = scmp.lt.s32.totalorder (!%p159_p10), %s556_s15, 1  ;;  %v567_v16 = vmov (!%p159_p10), 683565275  }
   0xf   : > { %162 = sbr.rel (%p159_p10) target bundleno = 245 (0xf5), region = 32  ;;  %481 = vset.pattern.permute.xlu0 (!%p159_p10), %v566_v1  ;;  %v193_v2 = vld [vmem:[%s739_s2] sm:$0xf] (!%p159_p10)  ;;  %v568_v18 = vmov (!%p159_p10), 2475754826   ;;  %s181_s8 = sand.u32 (!%p159_p10), 1, %s548_s13  }
  0x10   : > { %196 = vperm.xlu0 (!%p159_p10), %481, %v192_v0   ;;  %v569_v21 = vmov (!%p159_p10), 2131351028   ;;  %v570_v24 = vmov (!%p159_p10), 2102212464   ;;  %v571_v27 = vmov (!%p159_p10), 920167782  }
  0x11   : > { %v572_v30 = vmov (!%p159_p10), 1326507024   ;;  %s405_s9 = sshll.u32 (!%p159_p10), %s181_s8, 2  ;;  %s412_s10 = sshll.u32 (!%p159_p10), %s556_s15, 6  ;;  %vm312_vm13 = vcmask (!%p159_p10), 125952  }
  0x12   : > { %s183_s11 = scalar_lea.vmem (!%p159_p10), [#allocation2], %s405_s9  ;;  %s690_s23 = scalar_lea.hbm (!%p159_p10), %s740_s3, %s412_s10 }
  0x13   : > { %s329_s18 = sshll.u32 (!%p159_p10), %s183_s11, 4  ;;  %s315_s26 = scalar_lea.sflag (!%p159_p10), [#allocation3], %s181_s8  ;;  %s692_s18 = int_to_ptr.vmem [resolvable:$true] %s329_s18 }
  0x14   : > { %307 = vperm.xlu0 (!%p159_p10), %481, %v193_v2   ;;  %s486_s27 = scalar_lea.vmem (!%p159_p10), %s692_s18, 64 }
  0x15   : > { %p487_p12 = scmp.ne.s32.totalorder (!%p159_p10), %s692_s18, %s486_s27 }
  0x16   : > { %s185_s30 = scalar_select %p184_p11, %s556_s15, 1 }
  0x17   : > { %p488_p13 = pnand %p487_p12, %p634_p4  ;;  %s573_s15 = smov [#allocation2]  }
  0x18   : > { %s406_s4 = sshll.u32 %s185_s30, 2  ;;  %s490_s28 = sshll.u32 %s573_s15, 4  ;;  %s491_s28 = int_to_ptr.vmem [resolvable:$false] %s490_s28 }
  0x19   : > { %s190_s7 = scalar_lea.vmem %s737_s0, %s406_s4  ;;  %p489_p0 = pneg %p488_p13 }
  0x1a   : > { %v660_v3 = vld [vmem:[%s190_s7] sm:$0xf]  ;;  %s492_s29 = scalar_lea.vmem %s491_s28, 128  ;;  %p493_p1 = scmp.lt.s32.totalorder %s692_s18, %s491_s28 }
  0x1b   : > { %p494_p2 = scmp.lt.s32.totalorder %s492_s29, %s486_s27 }
  0x1d   : > { %p495_p3 = por %p494_p2, %p493_p1 }
  0x1f   : > { %p496_p5 = pnand %p495_p3, %p489_p0 }
  0x8f   : > { %v197_v4 = vpop.permute.xlu0 %196 }
  0x90   : > { %v663_v5 = vmul.f32 %v197_v4, %v660_v3 }
  0x92   : > { %v203_v6 = vand.u32 2139095040, %v663_v5  ;;  %v200_v10 = vand.u32 2147483647, %v663_v5  ;;  %vm202_vm7 = vcmp.lt.s32.totalorder %v663_v5, 0  ;;  %vm292_vm12 = vweird.f32 %v663_v5 }
  0x94   : > { %v204_v7 = vshrl.u32 %v203_v6, 23  ;;  %v207_v13 = vand.u32 8388607, %v200_v10  ;;  %vm201_vm8 = vcmp.le.f32.partialorder %v200_v10, 0.7853982 }
  0x96   : > { %v407_v8 = vadd.s32 4294967169, %v204_v7  ;;  %v208_v32 = vor.u32 8388608, %v207_v13 }
  0x98   : > { %v210_v9 = vadd.s32 1, %v407_v8  ;;  %v248_v46 = vshll.u32 %v208_v32, 8 }
  0x9a   : > { %vm211_vm0 = vcmp.gt.s32.totalorder %v210_v9, 0 }
  0x9b   : > { %v212_v11 = vsel %vm211_vm0, %v210_v9, 0 }
  0x9c   : > { %v214_v12 = vand.u32 31, %v212_v11  ;;  %v213_v15 = vshrl.u32 %v212_v11, 5 }
  0x9e   : > { %v215_v14 = vsub.s32 32, %v214_v12  ;;  %v217_v17 = vshll.u32 %v567_v16, %v214_v12  ;;  %v220_v19 = vshll.u32 %v568_v18, %v214_v12  ;;  %v223_v23 = vshll.u32 %v569_v21, %v214_v12 }
  0x9f   : > { %v226_v26 = vshll.u32 %v570_v24, %v214_v12  ;;  %v229_v29 = vshll.u32 %v571_v27, %v214_v12  ;;  %vm232_vm1 = vcmp.lt.s32.totalorder %v213_v15, 1  ;;  %vm235_vm2 = vcmp.lt.s32.totalorder %v213_v15, 4 }
  0xa0   : > { %v218_v20 = vshrl.u32 %v568_v18, %v215_v14  ;;  %v221_v22 = vshrl.u32 %v569_v21, %v215_v14  ;;  %v224_v25 = vshrl.u32 %v570_v24, %v215_v14  ;;  %v227_v28 = vshrl.u32 %v571_v27, %v215_v14 }
  0xa1   : > { %v230_v31 = vshrl.u32 %v572_v30, %v215_v14  ;;  %v216_v41 = vshrl.u32 %v567_v16, %v215_v14  ;;  %vm234_vm3 = vcmp.lt.s32.totalorder %v213_v15, 3  ;;  %vm233_vm4 = vcmp.lt.s32.totalorder %v213_v15, 2 }
  0xa2   : > { %v219_v33 = vor.u32 %v218_v20, %v217_v17  ;;  %v222_v34 = vor.u32 %v221_v22, %v220_v19  ;;  %v225_v35 = vor.u32 %v224_v25, %v223_v23  ;;  %v228_v36 = vor.u32 %v227_v28, %v226_v26 }
  0xa3   : > { %v231_v37 = vor.u32 %v230_v31, %v229_v29 }
  0xa4   : > { %v237_v38 = vsel %vm235_vm2, %v225_v35, 2102212464  ;;  %v240_v39 = vsel %vm232_vm1, %v219_v33, %v222_v34  ;;  %v244_v40 = vsel %vm232_vm1, %v222_v34, %v225_v35  ;;  %v241_v42 = vsel %vm235_vm2, %v228_v36, 920167782 }
  0xa5   : > { %v245_v43 = vsel %vm235_vm2, %v231_v37, 1326507024  ;;  %v242_v44 = vsel %vm234_vm3, %v225_v35, %v241_v42  ;;  %v236_v47 = vsel %vm232_vm1, %v216_v41, %v219_v33  ;;  %v238_v48 = vsel %vm234_vm3, %v222_v34, %v237_v38 }
  0xa6   : > { %v246_v45 = vsel %vm234_vm3, %v228_v36, %v245_v43  ;;  %v243_v49 = vsel %vm233_vm4, %v240_v39, %v242_v44  ;;  %v239_v55 = vsel %vm233_vm4, %v236_v47, %v238_v48  ;;  %v308_v36 = vpop.permute.xlu0 %307 }
  0xa7   : > { %v247_v50 = vsel %vm233_vm4, %v244_v40, %v246_v45  ;;  %v672_v53 = vmul.u32.u64.low %v248_v46, %v243_v49  ;;  %v673_v54 = vmul.u32.u64.high %v248_v46, %v243_v49, %v672_v53  ;;  %v255_v57 = vmul.u32 %v248_v46, %v239_v55 }
  0xa8   : > { %v669_v51 = vmul.u32.u64.low %v248_v46, %v247_v50  ;;  %v670_v52 = vmul.u32.u64.high %v248_v46, %v247_v50, %v669_v51 }
  0xa9   : > { %v258_v56 = vadd.s32 1, %v673_v54 }
  0xaa   : > { %vm257_vm5 = vc.u32 %v670_v52, %v672_v53  ;;  %v256_v7 = vadd.s32 %v672_v53, %v670_v52 }
  0xab   : > { %v259_v58 = vsel %vm257_vm5, %v258_v56, %v673_v54 }
  0xac   : > { %v260_v59 = vadd.s32 %v259_v58, %v255_v57 }
  0xae   : > { %v261_v60 = vadd.s32 536870912, %v260_v59 }
  0xb0   : > { %v262_v61 = vshrl.u32 %v261_v60, 30 }
  0xb2   : > { %v263_v62 = vshll.u32 %v262_v61, 30  ;;  %v286_v20 = vsub.s32 4, %v262_v61 }
  0xb4   : > { %v264_v63 = vsub.s32 %v260_v59, %v263_v62  ;;  %v287_v23 = vsel %vm202_vm7, %v286_v20, %v262_v61 }
  0xb5   : > { %v289_v25 = vsel %vm201_vm8, 0, %v287_v23 }
  0xb6   : > { %v266_v0 = vsub.s32 0, %v264_v63  ;;  %v293_v26 = vadd.s32 3, %v289_v25 }
  0xb8   : > { %v408_v1 = vmin.u32 %v266_v0, %v264_v63  ;;  %v294_v27 = vand.u32 3, %v293_v26 }
  0xba   : > { %v268_v2 = vclz %v408_v1  ;;  %vm299_vm9 = vcmp.eq.s32.totalorder %v294_v27, 2  ;;  %vm296_vm10 = vcmp.eq.s32.totalorder %v294_v27, 0  ;;  %vm295_vm11 = vcmp.lt.s32.totalorder %v294_v27, 2 }
  0xbc   : > { %v409_v4 = vadd.s32 4294967294, %v268_v2 }
  0xbe   : > { %vm410_vm6 = vcmp.lt.s32.totalorder %v409_v4, 0 }
  0xbf   : > { %v271_v6 = vsel %vm410_vm6, 0, %v409_v4 }
  0xc0   : > { %v272_v8 = vsub.s32 32, %v271_v6  ;;  %v276_v9 = vsub.s32 4294967266, %v271_v6  ;;  %v273_v11 = vshll.u32 %v264_v63, %v271_v6 }
  0xc2   : > { %v274_v12 = vshrl.u32 %v256_v7, %v272_v8  ;;  %v277_v13 = vadd.s32 127, %v276_v9 }
  0xc4   : > { %v275_v14 = vor.u32 %v274_v12, %v273_v11  ;;  %v278_v15 = vshll.u32 %v277_v13, 23 }
  0xc6   : > { %v279_v16 = vor.u32 4788187, %v278_v15  ;;  %v282_v18 = vcvt.s32.f32 %v275_v14 }
  0xc8   : > { %v280_v17 = vand.u32 2147483647, %v279_v16 }
  0xca   : > { %v283_v19 = vmul.f32 %v282_v18, %v280_v17 }
  0xcc   : > { %v284_v21 = vxor.u32 2147483648, %v283_v19 }
  0xce   : > { %v285_v22 = vsel %vm202_vm7, %v284_v21, %v283_v19 }
  0xcf   : > { %v288_v24 = vsel %vm201_vm8, %v663_v5, %v285_v22 }
  0xd0   : > { %482 = vcosq.f32 %v288_v24 }
  0xd1   : > { %484 = vsinq.f32 %v288_v24 }
  0xda   : > { %v483_v28 = vpop.eup %482 }
  0xdb   : > { %v485_v29 = vpop.eup %484  ;;  %v300_v30 = vxor.u32 2147483648, %v483_v28 }
  0xdc   : > { %v297_v31 = vxor.u32 2147483648, %v485_v29 }
  0xdd   : > { %v301_v32 = vsel %vm299_vm9, %v300_v30, %v485_v29 }
  0xde   : > { %v298_v10 = vsel %vm296_vm10, %v483_v28, %v297_v31 }
  0xdf   : > { %v302_v33 = vsel %vm295_vm11, %v298_v10, %v301_v32 }
  0xe0   : > { %v303_v34 = vsel %vm292_vm12, nan, %v302_v33 }
  0xe1   : > { %v304_v35 = vmul.f32 %v303_v34, %v303_v34 }
  0xe3   : > { %v310_v37 = vmul.f32 %v308_v36, %v304_v35 }
  0xe5   : > { %v311_v38 = vadd.f32 %v310_v37, %v660_v3 }
  0xe7   : > { %313 = vst.msk [vmem:[%s183_s11] sm:$0xf] %vm312_vm13, %v311_v38 }
  0xe8   : > { %499 = shalt.err (!%p496_p5)
}
  0xe9   : > { %s500_s30 = scalar_lea.hbm %s690_s23, 64  ;;  %s504_s6 = scalar_lea.hbm %s740_s3, 128 }
  0xea   : > { %p501_p6 = scmp.ne.s32.totalorder %s690_s23, %s500_s30  ;;  %p505_p10 = scmp.lt.u32.totalorder %s690_s23, %s740_s3 }
  0xeb   : > { %p506_p11 = scmp.lt.u32.totalorder %s504_s6, %s500_s30  ;;  %p508_p13 = scmp.lt.u32.totalorder %s500_s30, %s690_s23 }
  0xec   : > { %p502_p7 = pnand %p501_p6, %p634_p4 }
  0xed   : > { %p507_p12 = por %p506_p11, %p505_p10 }
  0xee   : > { %p503_p9 = pneg %p502_p7 }
  0xef   : > { %p509_p0 = por %p508_p13, %p507_p12 }
  0xf1   : > { %p510_p1 = pnand %p509_p0, %p503_p9 }
  0xf3   : > { %513 = shalt.err (!%p510_p1)
}
  0xf4   : > { %419 = dma.vmem_to_hbm [thread:$0]  (%p634_p4), %s692_s18, 64, %s690_s23, %s315_s26  }
  0xf5 PF: > { %p425_p2 = scmp.ge.s32.totalorder %s564_s17, 2  ;;  %s341_s9 = sand.u32 1, %s544_s12  }
  0xf6   : > { %s342_s10 = scalar_lea.sflag [#allocation3], %s341_s9 }
  0xf7   : > { %p422_p3 = pnand %p425_p2, %p641_p8 }
  0xf9   : > { %539 = dma.done.wait (!%p422_p3), %s342_s10, 64  }
  0xfa   : > { %541 = vsyncadd (!%p422_p3), %s342_s10, 4294967232  ;;  %s16_s17 = sadd.s32 1, %s564_s17   ;;  %s743_s12 = smov %s548_s13 }
  0xfb   : > { %p13_p5 = scmp.ge.s32.totalorder %s16_s17, 4   ;;  %s744_s13 = smov %s552_s14 }
  0xfc   : > { %s745_s14 = smov %s647_s25  ;;  %s746_s15 = smov %s560_s16 }
  0xfd   : > { %s747_s16 = smov %s749_s20  ;;  %15 = sbr.rel (!%p13_p5) target bundleno = 4 (0x4), region = 67 }
 0x104   :  { %347 = vsyncpa [#allocation3], 1 }
 0x105   :  { %349 = vsyncpa [#allocation3 + $0x1], 1 }

</bundles_post_ra>
